<compile_context>
chip_gen: v7x
topology: tpu7x:2x2x1
jax: 0.10.0
libtpu: 0.0.40
codegen_flags: <defaults>
</compile_context>

<pallas_src>
import functools

import jax
import jax.numpy as jnp
import numpy as np
from jax.experimental import pallas as pl
from jax.experimental.pallas import tpu as pltpu

# Small hyperparameters consistent with the module's constructor
WINDOW = 16        # window_size (input sequence length L)
FORECAST = 8       # forcast_size
KSIZE = 5          # moving-average kernel_size (odd, as in DLinear)
CHANNELS = 4       # feature_size
BATCH = 2
INDIVIDUAL = False # shared Linear across channels (individual=False branch)

LANE = 128         # pad the forecast axis to full lane width for unmasked stores


def _dlinear_kernel(x_ref, w_ref, b_ref, o_ref):
    # x_ref: (R, L)   w_ref: (L, Fp)   b_ref: (1, Fp)   o_ref: (R, Fp)
    # Single fused GEMM: decomposition + both Linear heads already folded into w_ref.
    o_ref[...] = (jnp.dot(x_ref[...], w_ref[...], preferred_element_type=jnp.float32)
                  + b_ref[...])


@functools.lru_cache(maxsize=None)
def _moving_avg_matrix_np(L, k):
    """(L, L) matrix A such that (x @ A)[..., t] equals the replicate-padded
    AvgPool1d(kernel=k, stride=1) used by moving_avg.  Host-side numpy + cached."""
    pad = (k - 1) // 2
    A = np.zeros((L, L), np.float32)
    for t in range(L):
        for j in range(k):
            src = min(max(t - pad + j, 0), L - 1)   # replicate padding == clamp
            A[src, t] += 1.0 / k
    return A


def ltsf_dlinear_forward(x, wt, bt, ws, bs, ksize):
    """x: (B, L, C) float32  ->  (B, F, C) float32  (matches PyTorch forward)."""
    B, L, C = x.shape
    F = wt.shape[0]
    Fp = max(LANE, ((F + LANE - 1) // LANE) * LANE)   # lane-dense output width

    # --- trace-time constant math (no kernel work) ---
    A = jnp.asarray(_moving_avg_matrix_np(L, ksize))          # (L, L)
    wt_t, ws_t = wt.T, ws.T                                   # (L, F): Linear is x @ W.T
    w_eff = ws_t + A @ (wt_t - ws_t)                          # (L, F) fused weight
    b_eff = (bt + bs).reshape(1, F)                           # (1, F) fused bias

    # pad the F axis out to 128 lanes so the kernel's stores are unmasked
    w_pad = jnp.zeros((L, Fp), jnp.float32).at[:, :F].set(w_eff)
    b_pad = jnp.zeros((1, Fp), jnp.float32).at[:, :F].set(b_eff)

    # rows = B*C, time axis on lanes  (layout glue around the kernel)
    xr = jnp.transpose(x, (0, 2, 1)).reshape(B * C, L)        # (B*C, L)

    out = pl.pallas_call(
        _dlinear_kernel,
        out_shape=jax.ShapeDtypeStruct((B * C, Fp), jnp.float32),
        grid_spec=pltpu.PrefetchScalarGridSpec(
            num_scalar_prefetch=0,
            grid=(1,),                                        # single grid step
            in_specs=[
                pl.BlockSpec((B * C, L), lambda i: (0, 0)),
                pl.BlockSpec((L, Fp), lambda i: (0, 0)),
                pl.BlockSpec((1, Fp), lambda i: (0, 0)),
            ],
            out_specs=pl.BlockSpec((B * C, Fp), lambda i: (0, 0)),
        ),
        compiler_params=pltpu.CompilerParams(dimension_semantics=("arbitrary",)),
    )(xr, w_pad, b_pad)

    out = out[:, :F].reshape(B, C, F)                         # drop lane padding
    return jnp.transpose(out, (0, 2, 1))                      # (B, F, C)


def ref_forward(x, wt, bt, ws, bs, ksize):
    """Pure-JAX reference mirroring the PyTorch module exactly."""
    pad = (ksize - 1) // 2
    L = x.shape[1]
    front = jnp.repeat(x[:, 0:1, :], pad, axis=1)
    end = jnp.repeat(x[:, -1:, :], pad, axis=1)
    xp = jnp.concatenate([front, x, end], axis=1)                          # (B, L+2p, C)
    mov = jnp.stack([xp[:, j:j + L, :] for j in range(ksize)], 0).mean(0)  # AvgPool1d
    trend_init = jnp.transpose(mov, (0, 2, 1))                             # (B, C, L)
    seasonal_init = jnp.transpose(x - mov, (0, 2, 1))
    trend_out = trend_init @ wt.T + bt
    seasonal_out = seasonal_init @ ws.T + bs
    return jnp.transpose(trend_out + seasonal_out, (0, 2, 1))              # (B, F, C)


if __name__ == "__main__":
    key = jax.random.PRNGKey(0)
    kx, kb1, kb2 = jax.random.split(key, 3)

    # Input: (batch, window_size, feature_size)
    x = jax.random.normal(kx, (BATCH, WINDOW, CHANNELS), dtype=jnp.float32)

    # Parameters (individual=False branch of __init__):
    # weights are explicitly set to (1/window_size) * ones([forcast_size, window_size]);
    # biases keep nn.Linear's default uniform(-1/sqrt(W), 1/sqrt(W)) init, done
    # deterministically from PRNGKey(0)-derived keys.
    wt = jnp.full((FORECAST, WINDOW), 1.0 / WINDOW, dtype=jnp.float32)
    ws = jnp.full((FORECAST, WINDOW), 1.0 / WINDOW, dtype=jnp.float32)
    bound = 1.0 / (WINDOW ** 0.5)
    bt = jax.random.uniform(kb1, (FORECAST,), jnp.float32, -bound, bound)
    bs = jax.random.uniform(kb2, (FORECAST,), jnp.float32, -bound, bound)

    y = ltsf_dlinear_forward(x, wt, bt, ws, bs, KSIZE)
    y = jax.block_until_ready(y)

    y_ref = ref_forward(x, wt, bt, ws, bs, KSIZE)
    assert y.shape == (BATCH, FORECAST, CHANNELS)
    assert jnp.allclose(y, y_ref, atol=1e-5, rtol=1e-5), "mismatch vs reference"

    print("KERNEL_OK")
</pallas_src>

<mosaic_0001>
module attributes {stable_mosaic.version = 11 : i64} {
  func.func @_dlinear_kernel(%arg0: i32, %arg1: memref<8x16xf32, #tpu.memory_space<vmem>>, %arg2: memref<16x128xf32, #tpu.memory_space<vmem>>, %arg3: memref<1x128xf32, #tpu.memory_space<vmem>>, %arg4: memref<8x128xf32, #tpu.memory_space<vmem>>) attributes {dimension_semantics = [#tpu.dimension_semantics<arbitrary>], iteration_bounds = array<i64: 1>, scalar_prefetch = 0 : i64, scratch_operands = 0 : i64, tpu.core_type = #tpu.core_type<tc>, window_params = [{pipeline_mode = #tpu.pipeline_mode<synchronous>, transform_indices = @transform_0, window_bounds = array<i64: 8, 16>}, {pipeline_mode = #tpu.pipeline_mode<synchronous>, transform_indices = @transform_1, window_bounds = array<i64: 16, 128>}, {pipeline_mode = #tpu.pipeline_mode<synchronous>, transform_indices = @transform_2, window_bounds = array<i64: 1, 128>}, {pipeline_mode = #tpu.pipeline_mode<synchronous>, transform_indices = @transform_3, window_bounds = array<i64: 8, 128>}]} {
    %c0 = arith.constant 0 : index
    %c0_0 = arith.constant 0 : index
    %0 = vector.load %arg1[%c0, %c0_0] : memref<8x16xf32, #tpu.memory_space<vmem>>, vector<8x16xf32>
    %c0_1 = arith.constant 0 : index
    %c0_2 = arith.constant 0 : index
    %1 = vector.load %arg2[%c0_1, %c0_2] : memref<16x128xf32, #tpu.memory_space<vmem>>, vector<16x128xf32>
    %cst = arith.constant dense<0.000000e+00> : vector<8x128xf32>
    %2 = tpu.matmul %0, %1, %cst {dimension_numbers = #tpu.dot_dimension_numbers<[1], [0], [0], [1], [0, 0, 1, 1], [], []>} : vector<8x16xf32>, vector<16x128xf32>, vector<8x128xf32> -> vector<8x128xf32>
    %c0_3 = arith.constant 0 : index
    %c0_4 = arith.constant 0 : index
    %3 = vector.load %arg3[%c0_3, %c0_4] : memref<1x128xf32, #tpu.memory_space<vmem>>, vector<1x128xf32>
    %4 = vector.broadcast %3 : vector<1x128xf32> to vector<8x128xf32>
    %5 = arith.addf %2, %4 : vector<8x128xf32>
    %c0_5 = arith.constant 0 : index
    %c0_6 = arith.constant 0 : index
    %6 = vector.load %arg4[%c0_5, %c0_6] : memref<8x128xf32, #tpu.memory_space<vmem>>, vector<8x128xf32>
    tpu.vector_store %arg4[%c0_5, %c0_6], %5 {strides = array<i32>} : memref<8x128xf32, #tpu.memory_space<vmem>>, vector<8x128xf32>,
    return
  }
  func.func @transform_0(%arg0: i32) -> (i32, i32) {
    %c0_i32 = arith.constant 0 : i32
    %c0_i32_0 = arith.constant 0 : i32
    %c0_i32_1 = arith.constant 0 : i32
    return %c0_i32, %c0_i32_0 : i32, i32
  }
  func.func @transform_1(%arg0: i32) -> (i32, i32) {
    %c0_i32 = arith.constant 0 : i32
    %c0_i32_0 = arith.constant 0 : i32
    %c0_i32_1 = arith.constant 0 : i32
    return %c0_i32, %c0_i32_0 : i32, i32
  }
  func.func @transform_2(%arg0: i32) -> (i32, i32) {
    %c0_i32 = arith.constant 0 : i32
    %c0_i32_0 = arith.constant 0 : i32
    %c0_i32_1 = arith.constant 0 : i32
    return %c0_i32, %c0_i32_0 : i32, i32
  }
  func.func @transform_3(%arg0: i32) -> (i32, i32) {
    %c0_i32 = arith.constant 0 : i32
    %c0_i32_0 = arith.constant 0 : i32
    %c0_i32_1 = arith.constant 0 : i32
    return %c0_i32, %c0_i32_0 : i32, i32
  }
}

</mosaic_0001>

<bundles_post_ra>
// kernel: tpu_custom_call.1
= control target key start
LH: loop header
LB: loop body
LE: loop exit
PB: predicated region body
PF: predicated region fallthrough
CT: control target
= control target key end

     0   :  { %8 = vsyncpa [#allocation3], 0  ;;  %s311_s0 = inlined_call_operand.hbm [shape: f32[8,16], index: 0, kind: input, shape index: {}]   ;;  %s312_s1 = inlined_call_operand.hbm [shape: f32[16,128], index: 1, kind: input, shape index: {}]   ;;  %s313_s2 = inlined_call_operand.vmem [shape: f32[1,128], index: 2, kind: input, shape index: {}]   ;;  %s314_s3 = inlined_call_operand.hbm [shape: f32[8,128], index: 3, kind: output, shape index: {}]  }
   0x1   :  { %9 = vsyncpa [#allocation6], 0 }
   0x2   :  { %10 = vsyncpa [#allocation4], 0  ;;  %s237_s12 = smov [#allocation2]   ;;  %s238_s14 = smov [#allocation5]  }
   0x3   :  { %s17_s13 = sshll.u32 %s237_s12, 4  ;;  %s26_s15 = sshll.u32 %s238_s14, 4  ;;  %s18_s13 = int_to_ptr.vmem [resolvable:$true] %s17_s13  ;;  %s265_s15 = int_to_ptr.vmem [resolvable:$true] %s26_s15 }
   0x4   :  { %s165_s18 = scalar_lea.hbm %s311_s0, 128 }
   0x5   :  { %p166_p0 = scmp.ne.s32.totalorder %s311_s0, %s165_s18  ;;  %p169_p1 = scmp.lt.u32.totalorder %s165_s18, %s311_s0 }
   0x7   :  { %p171_p2 = pnand %p169_p1, %p166_p0 }
   0x9   :  { %174 = shalt.err (!%p171_p2)
}
   0xa   :  { %s175_s23 = scalar_lea.vmem %s18_s13, 128  ;;  %p180_p4 = scmp.lt.s32.totalorder %s18_s13, %s18_s13 }
   0xb   :  { %p176_p3 = scmp.ne.s32.totalorder %s18_s13, %s175_s23  ;;  %p181_p5 = scmp.lt.s32.totalorder %s175_s23, %s175_s23 }
   0xd   :  { %p182_p6 = por %p181_p5, %p180_p4 }
   0xf   :  { %p183_p7 = pnand %p182_p6, %p176_p3 }
  0x11   :  { %186 = shalt.err (!%p183_p7)
}
  0x12   :  { %20 = dma.hbm_to_vmem [thread:$0]  %s311_s0, 128, %s18_s13, [#allocation3]  }
  0x13   :  { %s187_s28 = scalar_lea.hbm %s312_s1, 256 }
  0x14   :  { %p188_p8 = scmp.ne.s32.totalorder %s312_s1, %s187_s28  ;;  %p191_p9 = scmp.lt.u32.totalorder %s187_s28, %s312_s1 }
  0x16   :  { %p193_p10 = pnand %p191_p9, %p188_p8 }
  0x18   :  { %196 = shalt.err (!%p193_p10)
}
  0x19   :  { %s197_s6 = scalar_lea.vmem %s265_s15, 256  ;;  %p202_p12 = scmp.lt.s32.totalorder %s265_s15, %s265_s15 }
  0x1a   :  { %p198_p11 = scmp.ne.s32.totalorder %s265_s15, %s197_s6  ;;  %p203_p13 = scmp.lt.s32.totalorder %s197_s6, %s197_s6 }
  0x1c   :  { %p204_p0 = por %p203_p13, %p202_p12 }
  0x1e   :  { %p205_p1 = pnand %p204_p0, %p198_p11 }
  0x20   :  { %208 = shalt.err (!%p205_p1)
}
  0x21   :  { %s239_s0 = smov 128   ;;  %s240_s7 = smov 8  }
  0x22   :  { %32 = dma.hbm_to_vmem [thread:$0]  %s312_s1, 256, %s265_s15, [#allocation6], %s239_s0, %s239_s0, %s240_s7  }
  0x23   :  { %231 = dma.done.wait [#allocation3], 128  }
  0x24   :  { %232 = vsyncadd [#allocation3], 4294967168 }
  0x25   :  { %233 = dma.done.wait [#allocation6], 256  }
  0x26   :  { %234 = vsyncadd [#allocation6], 4294967040  ;;  %v241_v0 = vmov 0.0|0.0   ;;  %vm242_vm0 = vmmov 0   ;;  %v243_v1 = vmov 0.0   ;;  %v42_v2 = vld [vmem:[#allocation5] sm:$0xff] }
  0x27   :  { %154 = vmatprep.subr.bf16.mxu0 %v241_v0  ;;  %151 = vmatprep.mubr.msk.f32.mxu0 %vm242_vm0, %v243_v1  ;;  %v43_v3 = vld [vmem:[#allocation5 + $0x8] sm:$0xff]  ;;  %v41_v5 = vld [vmem:[#allocation2] sm:$0xff]  ;;  %vm51_vm1 = vcmask 130048   ;;  %s244_s1 = smov [#allocation7]  }
  0x28   :  { %v155_v4 = vpack.c.bf16 %v43_v3, %v42_v2  ;;  %v142_v6 = vld [vmem:[%s313_s2] ss:$0 sm:$0xff]  ;;  %s132_s12 = sshll.u32 %s244_s1, 4  ;;  %s133_s12 = int_to_ptr.vmem [resolvable:$true] %s132_s12 }
  0x29   :  { %s209_s13 = scalar_lea.vmem %s133_s12, 128  ;;  %p214_p3 = scmp.lt.s32.totalorder %s133_s12, %s133_s12 }
  0x2a   :  { %156 = vmatpush3.bf16.msra.mxu0 %v155_v4  ;;  %p210_p2 = scmp.ne.s32.totalorder %s133_s12, %s209_s13  ;;  %p215_p4 = scmp.lt.s32.totalorder %s209_s13, %s209_s13 }
  0x2c   :  { %p216_p5 = por %p215_p4, %p214_p3 }
  0x2d   :  { %152 = vmatmul.mubr.msk.f32.vlgmr.msra.gmra.mrb[0].mxu0 %vm51_vm1, %v41_v5 }
  0x2e   :  { %p217_p6 = pnand %p216_p5, %p210_p2 }
 0x100   :  { %v121_v7 = vpop.f32.mrb[0].mxu0 }
 0x101   :  { %v122_v8 = vadd.f32 %v142_v6, %v121_v7  ;;  %v153_v9 = vpop.f32.mrb[1].mxu0 }
 0x103   :  { %125 = vst [vmem:[#allocation7] sm:$0xff] %v122_v8 }
 0x104   :  { %220 = shalt.err (!%p217_p6)
}
 0x105   :  { %s221_s16 = scalar_lea.hbm %s314_s3, 128 }
 0x106   :  { %p222_p7 = scmp.ne.s32.totalorder %s314_s3, %s221_s16  ;;  %p225_p8 = scmp.lt.u32.totalorder %s221_s16, %s314_s3 }
 0x108   :  { %p227_p9 = pnand %p225_p8, %p222_p7 }
 0x10a   :  { %230 = shalt.err (!%p227_p9)
}
 0x10b   :  { %135 = dma.vmem_to_hbm [thread:$0]  %s133_s12, 128, %s314_s3, [#allocation4]  }
 0x10c   :  { %235 = dma.done.wait [#allocation4], 128  }
 0x10d   :  { %236 = vsyncadd [#allocation4], 4294967168 }
 0x10e   :  { %139 = vsyncpa [#allocation3], 1 }
 0x10f   :  { %140 = vsyncpa [#allocation6], 1 }
 0x110   :  { %141 = vsyncpa [#allocation4], 1 }

</bundles_post_ra>
